<compile_context>
chip_gen: v5e
topology: v5e:2x2
jax: 0.10.0
libtpu: 0.0.40
codegen_flags: <defaults>
</compile_context>

<pallas_src>
import jax
import jax.numpy as jnp
from jax import lax
from jax.experimental import pallas as pl
from jax.experimental.pallas import tpu as pltpu

LN_EPS = 1e-5  # torch.nn.LayerNorm default


def multiscan_kernel(w_ref, x_ref, o_ref, acc_ref):
    """Process one (tile_n, D) row tile for scan direction s = program_id(1).

    w_ref:   (S,) f32 softmaxed scan weights in SMEM.
    x_ref:   (tile_n, D) tile of scan s (leading S axis squeezed by the BlockSpec).
    o_ref:   (tile_n, D) output tile (same block across the S axis -> stays resident).
    acc_ref: (tile_n, D) f32 VMEM accumulator scratch.
    """
    s = pl.program_id(1)

    xv = x_ref[...].astype(jnp.float32)                       # (TN, D)
    inv_d = jnp.float32(1.0 / xv.shape[-1])

    # One-pass mean / variance: both cross-lane reductions can issue back-to-back.
    sum_x = jnp.sum(xv, axis=-1, keepdims=True)
    sum_x2 = jnp.sum(xv * xv, axis=-1, keepdims=True)
    mean = sum_x * inv_d
    var = jnp.maximum(sum_x2 * inv_d - mean * mean, 0.0)      # biased var (matches torch LN)

    # Fold the scan weight into the inverse std: a single (TN, 1) column scale.
    scale = lax.rsqrt(var + LN_EPS) * w_ref[s]
    contrib = (xv - mean) * scale                             # (TN, D)

    @pl.when(s == 0)
    def _init():
        acc_ref[...] = contrib

    @pl.when(s > 0)
    def _accum():
        acc_ref[...] = acc_ref[...] + contrib

    @pl.when(s == pl.num_programs(1) - 1)
    def _finalize():
        o_ref[...] = acc_ref[...].astype(o_ref.dtype)


def _choose_tile_n(n, d, in_itemsize, out_itemsize,
                   vmem_budget_bytes=20 * 1024 * 1024):
    """Largest row tile (multiple of 8, capped at 2048) whose pipeline fits the budget.

    Live VMEM per grid step is approximately:
      input tile  : tile_n * d * in_itemsize  * 2   (double buffered)
      output tile : tile_n * d * out_itemsize * 2   (double buffered)
      accumulator : tile_n * d * 4                  (f32 scratch)
    The 20 MiB budget stays comfortably inside v5e/v6e (128 MiB physical) and
    v7x (64 MiB physical) with a 32 MiB scoped limit requested below.
    """
    per_row = d * (2 * in_itemsize + 2 * out_itemsize + 4)
    tile = vmem_budget_bytes // max(per_row, 1)
    tile = min(int(tile), 2048, ((n + 7) // 8) * 8)
    tile = max(8, (tile // 8) * 8)
    return tile


def multiscan_forward(xs_stacked, weights_param, tile_n=None):
    """
    xs_stacked:    [S, B, L, D]  (per-direction [B, L, D] sequences, stacked)
    weights_param: [S, 1, 1, 1]  (the nn.Parameter from __init__)
    returns:       [B, L, D]
    """
    S, B, L, D = xs_stacked.shape
    N = B * L
    in_itemsize = jnp.dtype(xs_stacked.dtype).itemsize
    if tile_n is None:
        tile_n = _choose_tile_n(N, D, in_itemsize, in_itemsize)

    x = xs_stacked.reshape(S, N, D)

    # Pad the row axis to a tile multiple (ragged final tile). Zero rows are
    # harmless: mean = 0, var = 0 -> finite rsqrt(eps), contribution is 0.
    n_pad = (-N) % tile_n
    if n_pad:
        x = jnp.pad(x, ((0, 0), (0, n_pad), (0, 0)))
    n_padded = N + n_pad

    # Softmax over the S scan weights is tiny glue -> plain JAX.
    w = jax.nn.softmax(weights_param.reshape(S).astype(jnp.float32), axis=0)

    cost = pl.CostEstimate(
        flops=6 * S * N * D,
        transcendentals=S * N,
        bytes_accessed=(S + 1) * N * D * in_itemsize,
    )

    out = pl.pallas_call(
        multiscan_kernel,
        out_shape=jax.ShapeDtypeStruct((n_padded, D), xs_stacked.dtype),
        grid_spec=pltpu.PrefetchScalarGridSpec(
            num_scalar_prefetch=0,
            grid=(n_padded // tile_n, S),
            in_specs=[
                # Softmaxed weights: whole [S] vector in SMEM, read by dynamic index.
                pl.BlockSpec(memory_space=pltpu.SMEM),
                # One scan direction's row tile; leading S axis squeezed to keep
                # the per-step DMA block small (S handled by the reduction axis).
                pl.BlockSpec((None, tile_n, D), lambda i, s: (s, i, 0)),
            ],
            out_specs=pl.BlockSpec((tile_n, D), lambda i, s: (i, 0)),
            scratch_shapes=[pltpu.VMEM((tile_n, D), jnp.float32)],
        ),
        compiler_params=pltpu.CompilerParams(
            dimension_semantics=("parallel", "arbitrary"),
            vmem_limit_bytes=32 * 1024 * 1024,
        ),
        cost_estimate=cost,
    )(w, x)

    if n_pad:
        out = out[:N]
    return out.reshape(B, L, D)


def reference_forward(xs_stacked, weights_param):
    S = xs_stacked.shape[0]
    w = jax.nn.softmax(weights_param.reshape(S).astype(jnp.float32), axis=0)
    xf = xs_stacked.astype(jnp.float32)
    mean = jnp.mean(xf, axis=-1, keepdims=True)
    var = jnp.mean((xf - mean) ** 2, axis=-1, keepdims=True)
    xn = (xf - mean) * lax.rsqrt(var + LN_EPS)
    return jnp.sum(xn * w[:, None, None, None], axis=0).astype(xs_stacked.dtype)


if __name__ == "__main__":
    # Small shapes consistent with the module: 8 scan directions, token_size=(4,4)
    S = len(("h", "h_flip", "v", "v_flip", "w2", "w2_flip", "w7", "w7_flip"))
    B, H, W, D = 2, 4, 4, 32
    L = H * W

    key = jax.random.PRNGKey(0)
    k_x, k_w = jax.random.split(key)
    # The list of per-direction [B, L, D] inputs that forward() receives, stacked.
    xs_stacked = jax.random.normal(k_x, (S, B, L, D), dtype=jnp.float32)
    # Deterministic init matching __init__: 0.001 * randn(len(choices), 1, 1, 1)
    weights_param = 0.001 * jax.random.normal(k_w, (S, 1, 1, 1), dtype=jnp.float32)

    ref = reference_forward(xs_stacked, weights_param)

    # Default (auto-sized tile, no padding needed at these shapes).
    out = multiscan_forward(xs_stacked, weights_param)
    out = jax.block_until_ready(out)
    assert out.shape == (B, L, D)
    assert jnp.allclose(out, ref, atol=2e-5, rtol=2e-5)

    # Exercise the ragged/padded-tile path (tile_n=24 does not divide N=32).
    out_ragged = multiscan_forward(xs_stacked, weights_param, tile_n=24)
    out_ragged = jax.block_until_ready(out_ragged)
    assert jnp.allclose(out_ragged, ref, atol=2e-5, rtol=2e-5)

    print("KERNEL_OK")
</pallas_src>

<mosaic_0001>
module attributes {stable_mosaic.version = 11 : i64} {
  func.func @multiscan_kernel(%arg0: i32, %arg1: i32, %arg2: memref<8xf32, #tpu.memory_space<smem>>, %arg3: memref<1x32x32xf32, #tpu.memory_space<vmem>>, %arg4: memref<32x32xf32, #tpu.memory_space<vmem>>, %arg5: memref<32x32xf32, #tpu.memory_space<vmem>>) attributes {dimension_semantics = [#tpu.dimension_semantics<parallel>, #tpu.dimension_semantics<arbitrary>], iteration_bounds = array<i64: 1, 8>, scalar_prefetch = 0 : i64, scratch_operands = 1 : i64, tpu.core_type = #tpu.core_type<tc>, window_params = [{transform_indices = @transform_0, window_bounds = array<i64: 8>}, {transform_indices = @transform_1, window_bounds = array<i64: 1, 32, 32>}, {transform_indices = @transform_2, window_bounds = array<i64: 32, 32>}]} {
    %c0 = arith.constant 0 : index
    %c0_0 = arith.constant 0 : index
    %c0_1 = arith.constant 0 : index
    %0 = vector.load %arg3[%c0, %c0_0, %c0_1] : memref<1x32x32xf32, #tpu.memory_space<vmem>>, vector<1x32x32xf32>
    %1 = vector.shape_cast %0 : vector<1x32x32xf32> to vector<32x32xf32>
    %cst = arith.constant dense<0.000000e+00> : vector<32xf32>
    %2 = vector.multi_reduction <add>, %1, %cst [1] : vector<32x32xf32> to vector<32xf32>
    %3 = vector.shape_cast %2 : vector<32xf32> to vector<32x1xf32>
    %4 = arith.mulf %1, %1 : vector<32x32xf32>
    %cst_2 = arith.constant dense<0.000000e+00> : vector<32xf32>
    %5 = vector.multi_reduction <add>, %4, %cst_2 [1] : vector<32x32xf32> to vector<32xf32>
    %6 = vector.shape_cast %5 : vector<32xf32> to vector<32x1xf32>
    %cst_3 = arith.constant 3.125000e-02 : f32
    %7 = vector.broadcast %cst_3 : f32 to vector<32x1xf32>
    %8 = arith.mulf %3, %7 : vector<32x1xf32>
    %cst_4 = arith.constant 3.125000e-02 : f32
    %9 = vector.broadcast %cst_4 : f32 to vector<32x1xf32>
    %10 = arith.mulf %6, %9 : vector<32x1xf32>
    %11 = arith.mulf %8, %8 : vector<32x1xf32>
    %12 = arith.subf %10, %11 : vector<32x1xf32>
    %cst_5 = arith.constant 0.000000e+00 : f32
    %13 = vector.broadcast %cst_5 : f32 to vector<32x1xf32>
    %14 = arith.maximumf %12, %13 : vector<32x1xf32>
    %cst_6 = arith.constant 9.99999974E-6 : f32
    %15 = vector.broadcast %cst_6 : f32 to vector<32x1xf32>
    %16 = arith.addf %14, %15 : vector<32x1xf32>
    %17 = math.rsqrt %16 : vector<32x1xf32>
    %18 = arith.index_cast %arg1 : i32 to index
    %19 = memref.load %arg2[%18] : memref<8xf32, #tpu.memory_space<smem>>
    %20 = vector.broadcast %19 : f32 to vector<32x1xf32>
    %21 = arith.mulf %17, %20 : vector<32x1xf32>
    %22 = vector.broadcast %8 : vector<32x1xf32> to vector<32x32xf32>
    %23 = arith.subf %1, %22 : vector<32x32xf32>
    %24 = vector.broadcast %21 : vector<32x1xf32> to vector<32x32xf32>
    %25 = arith.mulf %23, %24 : vector<32x32xf32>
    %c0_i32 = arith.constant 0 : i32
    %26 = arith.cmpi eq, %arg1, %c0_i32 : i32
    %27 = arith.extui %26 : i1 to i32
    %c0_i32_7 = arith.constant 0 : i32
    %28 = arith.cmpi ne, %27, %c0_i32_7 : i32
    scf.if %28 {
      %c0_11 = arith.constant 0 : index
      %c0_12 = arith.constant 0 : index
      %35 = vector.load %arg5[%c0_11, %c0_12] : memref<32x32xf32, #tpu.memory_space<vmem>>, vector<32x32xf32>
      tpu.vector_store %arg5[%c0_11, %c0_12], %25 {strides = array<i32>} : memref<32x32xf32, #tpu.memory_space<vmem>>, vector<32x32xf32>,
    } else {
    }
    %c0_i32_8 = arith.constant 0 : i32
    %29 = arith.cmpi sgt, %arg1, %c0_i32_8 : i32
    %30 = arith.extui %29 : i1 to i32
    %c0_i32_9 = arith.constant 0 : i32
    %31 = arith.cmpi ne, %30, %c0_i32_9 : i32
    scf.if %31 {
      %c0_11 = arith.constant 0 : index
      %c0_12 = arith.constant 0 : index
      %35 = vector.load %arg5[%c0_11, %c0_12] : memref<32x32xf32, #tpu.memory_space<vmem>>, vector<32x32xf32>
      %36 = arith.addf %35, %25 : vector<32x32xf32>
      %c0_13 = arith.constant 0 : index
      %c0_14 = arith.constant 0 : index
      %37 = vector.load %arg5[%c0_13, %c0_14] : memref<32x32xf32, #tpu.memory_space<vmem>>, vector<32x32xf32>
      tpu.vector_store %arg5[%c0_13, %c0_14], %36 {strides = array<i32>} : memref<32x32xf32, #tpu.memory_space<vmem>>, vector<32x32xf32>,
    } else {
    }
    %c7_i32 = arith.constant 7 : i32
    %32 = arith.cmpi eq, %arg1, %c7_i32 : i32
    %33 = arith.extui %32 : i1 to i32
    %c0_i32_10 = arith.constant 0 : i32
    %34 = arith.cmpi ne, %33, %c0_i32_10 : i32
    scf.if %34 {
      %c0_11 = arith.constant 0 : index
      %c0_12 = arith.constant 0 : index
      %35 = vector.load %arg5[%c0_11, %c0_12] : memref<32x32xf32, #tpu.memory_space<vmem>>, vector<32x32xf32>
      %c0_13 = arith.constant 0 : index
      %c0_14 = arith.constant 0 : index
      %36 = vector.load %arg4[%c0_13, %c0_14] : memref<32x32xf32, #tpu.memory_space<vmem>>, vector<32x32xf32>
      tpu.vector_store %arg4[%c0_13, %c0_14], %35 {strides = array<i32>} : memref<32x32xf32, #tpu.memory_space<vmem>>, vector<32x32xf32>,
    } else {
    }
    return
  }
  func.func @transform_0(%arg0: i32, %arg1: i32) -> i32 {
    %c0_i32 = arith.constant 0 : i32
    %c0_i32_0 = arith.constant 0 : i32
    return %c0_i32 : i32
  }
  func.func @transform_1(%arg0: i32, %arg1: i32) -> (i32, i32, i32) {
    %c0_i32 = arith.constant 0 : i32
    %c0_i32_0 = arith.constant 0 : i32
    return %arg1, %arg0, %c0_i32 : i32, i32, i32
  }
  func.func @transform_2(%arg0: i32, %arg1: i32) -> (i32, i32) {
    %c0_i32 = arith.constant 0 : i32
    %c0_i32_0 = arith.constant 0 : i32
    return %arg0, %c0_i32 : i32, i32
  }
}

</mosaic_0001>

<bundles_post_ra>
// kernel: tpu_custom_call.1
= control target key start
LH: loop header
LB: loop body
LE: loop exit
PB: predicated region body
PF: predicated region fallthrough
CT: control target
= control target key end

     0   :  { %7 = vsyncpa [#allocation6], 0  ;;  %s861_s0 = inlined_call_operand.hbm [shape: f32[8], index: 0, kind: input, shape index: {}]   ;;  %s862_s1 = inlined_call_operand.hbm [shape: f32[8,32,32], index: 1, kind: input, shape index: {}]   ;;  %s863_s2 = inlined_call_operand.hbm [shape: f32[32,32], index: 2, kind: output, shape index: {}]  }
   0x1   :  { %8 = vsyncpa [#allocation4], 0 }
   0x2   :  { %10 = vsyncpa [#allocation4 + $0x1], 0 }
   0x3   :  { %11 = vsyncpa [#allocation5], 0  ;;  %s683_s9 = smov 0   ;;  %s685_s10 = smov 0  }
   0x4   :  { %s687_s11 = smov 0   ;;  %s689_s12 = smov 0  }
   0x5   :  { %s691_s13 = smov 0   ;;  %s693_s14 = smov 0  }
   0x6 LB: > { %s426_s15 = sadd.s32 4294967295, %s660_s14   ;;  %s59_s16 = sadd.s32 1, %s648_s11  ;;  %s660_s14 = sphi %s693_s14, %s17_s14   ;;  %s656_s13 = sphi %s691_s13, %s872_s13   ;;  %s652_s12 = sphi %s689_s12, %s871_s12   ;;  %s648_s11 = sphi %s687_s11, %s870_s11   ;;  %s644_s10 = sphi %s685_s10, %s869_s10   ;;  %s640_s9 = sphi %s683_s9, %s868_s9  }
   0x7   : > { %p66_p0 = scmp.ne.s32.totalorder %s648_s11, %s644_s10  ;;  %p67_p1 = scmp.eq.s32.totalorder %s660_s14, 0 }
   0x8   : > { %p72_p2 = scmp.ne.s32.totalorder %s644_s10, %s640_s9  ;;  %p719_p3 = scmp.eq.s32.totalorder %s426_s15, 0 }
   0x9   : > { %p68_p4 = por %p67_p1, %p66_p0  ;;  %p427_p5 = scmp.ge.s32.totalorder %s660_s14, 1 }
   0xa   : > { %p726_p6 = por %p719_p3, %p72_p2  ;;  %p109_p7 = scmp.lt.s32.totalorder %s660_s14, 9 }
   0xb   : > { %s121_s21 = sshll.u32 %s861_s0, 4  ;;  %p463_p10 = scmp.lt.s32.totalorder %s660_s14, 8  ;;  %s122_s21 = int_to_ptr.hbm [resolvable:$true] %s121_s21 }
   0xc   : > { %p734_p8 = pnand %p427_p5, %p109_p7  ;;  %s132_s23 = sand.u32 1, %s648_s11  }
   0xd   : > { %p744_p12 = pnand %p463_p10, %p68_p4  ;;  %s662_s25 = smov [#allocation3]  }
   0xe   : > { %p454_p9 = pneg %p734_p8  ;;  %s26_s26 = sadd.s32 1, %s656_s13 }
   0xf   : > { %s430_s27 = sshll.u32 %s132_s23, 5  ;;  %p27_p13 = scmp.ge.s32.totalorder %s26_s26, 8 }
  0x10   : > { %p455_p11 = pnand %p454_p9, %p719_p3  ;;  %s443_s28 = sshll.u32 %s656_s13, 5 }
  0x11   : > { %s136_s29 = scalar_lea.vmem [#allocation7], %s430_s27  ;;  %s874_s26 = smov (%p27_p13, %s26_s26), 0 }
  0x12   : > { %457 = dma.hbm_to_smem (!%p455_p11), %s122_s21, 16, %s662_s25, [#allocation6]  }
  0x13   : > { %s146_s30 = sshll.u32 %s136_s29, 4  ;;  %s143_s5 = scalar_lea.hbm %s862_s1, %s443_s28  ;;  %s147_s30 = int_to_ptr.vmem [resolvable:$true] %s146_s30 }
  0x14   : > { %s54_s6 = ssub.s32 %s656_s13, %s874_s26  ;;  %s144_s7 = sshll.u32 %s143_s5, 4  ;;  %s145_s7 = int_to_ptr.hbm [resolvable:$true] %s144_s7 }
  0x15   : > { %p57_p0 = scmp.eq.s32.totalorder %s54_s6, 0  ;;  %s133_s9 = scalar_lea.sflag [#allocation4], %s132_s23 }
  0x16   : > { %s663_s19 = smov 128   ;;  %s664_s20 = smov 8  }
  0x17   : > { %s760_s8 = scalar_select %p57_p0, %s648_s11, %s59_s16  }
  0x18   : > { %461 = dma.hbm_to_vmem [thread:$0]  (!%p744_p12), %s145_s7, 512, %s147_s30, %s133_s9, %s663_s19, %s663_s19, %s664_s20  }
  0x19   : > { %158 = sbr.rel (%p734_p8) target bundleno = 237 (0xed), region = 28 }
  0x1e   : > { %627 = dma.done.wait (%p719_p3), [#allocation6], 16  }
  0x1f   : > { %629 = vsyncadd (%p719_p3), [#allocation6], 4294967280  ;;  %s165_s21 = sand.u32 1, %s644_s10  }
  0x20   : > { %s435_s25 = sshll.u32 %s165_s21, 5  ;;  %s166_s16 = scalar_lea.sflag [#allocation4], %s165_s21 }
  0x21   : > { %s169_s27 = scalar_lea.vmem [#allocation7], %s435_s25 }
  0x22   : > { %631 = dma.done.wait (%p726_p6), %s166_s16, 512  }
  0x23   : > { %633 = vsyncadd (%p726_p6), %s166_s16, 4294966784 }
  0x24   : > { %175 = sfence }
  0x25   : > { %v775_v0 = vld [vmem:[%s169_s27 + $0x10] sm:$0xff]  ;;  %vm193_vm0 = vcmask 261120   ;;  %v777_v1 = vld [vmem:[%s169_s27] sm:$0xff]  ;;  %v785_v5 = vld [vmem:[%s169_s27 + $0x8] sm:$0xff]  ;;  %s286_s17 = sld [smem:[#allocation3 + %s652_s12]]  ;;  %p436_p1 = scmp.ne.s32.totalorder %s652_s12, 0 }
  0x26   : > { %v200_v2 = vsel %vm193_vm0, %v775_v0, 0.0  ;;  %v194_v3 = vsel %vm193_vm0, %v777_v1, 0.0  ;;  %v206_v4 = vmul.f32 %v777_v1, %v777_v1  ;;  %v788_v7 = vld [vmem:[%s169_s27 + $0x18] sm:$0xff]  ;;  %v207_v8 = vmul.f32 %v785_v5, %v785_v5 }
  0x27   : > { %201 = vadd.xlane.f32.xlu1 %v200_v2  ;;  %195 = vadd.xlane.f32.xlu0 %v194_v3  ;;  %v203_v9 = vsel %vm193_vm0, %v788_v7, 0.0  ;;  %v197_v10 = vsel %vm193_vm0, %v785_v5, 0.0  ;;  %v209_v12 = vmul.f32 %v788_v7, %v788_v7  ;;  %v208_v13 = vmul.f32 %v775_v0, %v775_v0 }
  0x28   : > { %v210_v6 = vsel %vm193_vm0, %v206_v4, 0.0  ;;  %v213_v11 = vsel %vm193_vm0, %v207_v8, 0.0 }
  0x29   : > { %211 = vadd.xlane.f32.xlu2 %v210_v6  ;;  %v219_v14 = vsel %vm193_vm0, %v209_v12, 0.0  ;;  %v216_v15 = vsel %vm193_vm0, %v208_v13, 0.0 }
  0x2b   : > { %v287_v54 = vstv %s286_s17 }
  0x2f   : > { %204 = vadd.xlane.f32.xlu1 %v203_v9  ;;  %198 = vadd.xlane.f32.xlu0 %v197_v10 }
  0x31   : > { %214 = vadd.xlane.f32.xlu2 %v213_v11 }
  0x37   : > { %220 = vadd.xlane.f32.xlu1 %v219_v14  ;;  %217 = vadd.xlane.f32.xlu0 %v216_v15 }
  0x9a   : > { %v202_v16 = vpop.xlane.xlu1 %201  ;;  %v196_v17 = vpop.xlane.xlu0 %195 }
  0x9b   : > { %v222_v18 = vmul.f32 0.03125, %v196_v17  ;;  %v807_v31 = vmul.f32 0.03125, %v202_v16 }
  0x9c   : > { %v212_v19 = vpop.xlane.xlu2 %211 }
  0x9d   : > { %v230_v20 = vmul.f32 %v222_v18, %v222_v18  ;;  %v226_v21 = vmul.f32 0.03125, %v212_v19  ;;  %v232_v37 = vmul.f32 %v807_v31, %v807_v31  ;;  %v292_v59 = vsub.f32 %v777_v1, %v222_v18 }
  0x9f   : > { %v234_v22 = vsub.f32 %v226_v21, %v230_v20 }
  0xa1   : > { %v238_v23 = vmax.f32 %v234_v22, 0.0 }
  0xa2   : > { %v205_v24 = vpop.xlane.xlu1 %204  ;;  %v199_v25 = vpop.xlane.xlu0 %198 }
  0xa3   : > { %v803_v26 = vmul.f32 0.03125, %v199_v25  ;;  %v242_v27 = vadd.f32 1e-05, %v238_v23  ;;  %v809_v32 = vmul.f32 0.03125, %v205_v24 }
  0xa4   : > { %v215_v28 = vpop.xlane.xlu2 %214 }
  0xa5   : > { %v231_v29 = vmul.f32 %v803_v26, %v803_v26  ;;  %521 = vrsqrt.f32 %v242_v27  ;;  %v227_v30 = vmul.f32 0.03125, %v215_v28  ;;  %v233_v38 = vmul.f32 %v809_v32, %v809_v32 }
  0xa6   : > { %vm252_vm2 = vweird.f32 %v242_v27  ;;  %v293_v1 = vsub.f32 %v785_v5, %v803_v26  ;;  %v295_v21 = vsub.f32 %v788_v7, %v809_v32  ;;  %v294_v5 = vsub.f32 %v775_v0, %v807_v31 }
  0xa7   : > { %v235_v33 = vsub.f32 %v227_v30, %v231_v29 }
  0xa9   : > { %v239_v34 = vmax.f32 %v235_v33, 0.0 }
  0xaa   : > { %v221_v35 = vpop.xlane.xlu1 %220  ;;  %v218_v36 = vpop.xlane.xlu0 %217 }
  0xab   : > { %v229_v39 = vmul.f32 0.03125, %v221_v35  ;;  %v228_v40 = vmul.f32 0.03125, %v218_v36  ;;  %v522_v41 = vpop.eup %521  ;;  %v243_v42 = vadd.f32 1e-05, %v239_v34 }
  0xac   : > { %v247_v43 = vmul.f32 %v522_v41, %v242_v27  ;;  %vm253_vm1 = vweird.f32 %v522_v41 }
  0xad   : > { %v237_v44 = vsub.f32 %v229_v39, %v233_v38  ;;  %v236_v45 = vsub.f32 %v228_v40, %v232_v37  ;;  %523 = vrsqrt.f32 %v243_v42  ;;  %vm254_vm3 = vmor %vm252_vm2, %vm253_vm1  ;;  %vm262_vm5 = vweird.f32 %v243_v42 }
  0xae   : > { %v248_v46 = vmul.f32 %v522_v41, %v247_v43 }
  0xaf   : > { %v241_v47 = vmax.f32 %v237_v44, 0.0  ;;  %v240_v48 = vmax.f32 %v236_v45, 0.0 }
  0xb0   : > { %v249_v49 = vmul.f32 0.5, %v248_v46 }
  0xb1   : > { %v245_v50 = vadd.f32 1e-05, %v241_v47  ;;  %v244_v51 = vadd.f32 1e-05, %v240_v48 }
  0xb2   : > { %v250_v52 = vsub.f32 1.5, %v249_v49 }
  0xb3   : > { %525 = vrsqrt.f32 %v245_v50  ;;  %v524_v53 = vpop.eup %523  ;;  %vm282_vm9 = vweird.f32 %v245_v50  ;;  %vm272_vm11 = vweird.f32 %v244_v51 }
  0xb4   : > { %527 = vrsqrt.f32 %v244_v51  ;;  %v251_v55 = vmul.f32 %v522_v41, %v250_v52  ;;  %v257_v56 = vmul.f32 %v524_v53, %v243_v42  ;;  %vm263_vm4 = vweird.f32 %v524_v53 }
  0xb5   : > { %vm264_vm6 = vmor %vm262_vm5, %vm263_vm4 }
  0xb6   : > { %v255_v57 = vsel %vm254_vm3, %v522_v41, %v251_v55  ;;  %v258_v58 = vmul.f32 %v524_v53, %v257_v56 }
  0xb7   : > { %v288_v60 = vmul.f32 %v287_v54, %v255_v57 }
  0xb8   : > { %v259_v62 = vmul.f32 0.5, %v258_v58 }
  0xb9   : > { %v526_v61 = vpop.eup %525  ;;  %v296_v2 = vmul.f32 %v292_v59, %v288_v60 }
  0xba   : > { %v528_v63 = vpop.eup %527  ;;  %v277_v3 = vmul.f32 %v526_v61, %v245_v50  ;;  %v260_v4 = vsub.f32 1.5, %v259_v62  ;;  %vm283_vm7 = vweird.f32 %v526_v61 }
  0xbb   : > { %v267_v6 = vmul.f32 %v528_v63, %v244_v51  ;;  %vm273_vm8 = vweird.f32 %v528_v63  ;;  %vm284_vm10 = vmor %vm282_vm9, %vm283_vm7 }
  0xbc   : > { %v278_v8 = vmul.f32 %v526_v61, %v277_v3  ;;  %v261_v9 = vmul.f32 %v524_v53, %v260_v4  ;;  %vm274_vm12 = vmor %vm272_vm11, %vm273_vm8 }
  0xbd   : > { %v268_v10 = vmul.f32 %v528_v63, %v267_v6 }
  0xbe   : > { %v279_v11 = vmul.f32 0.5, %v278_v8  ;;  %v265_v12 = vsel %vm264_vm6, %v524_v53, %v261_v9 }
  0xbf   : > { %v269_v13 = vmul.f32 0.5, %v268_v10  ;;  %v289_v14 = vmul.f32 %v287_v54, %v265_v12 }
  0xc0   : > { %v280_v15 = vsub.f32 1.5, %v279_v11 }
  0xc1   : > { %v270_v16 = vsub.f32 1.5, %v269_v13  ;;  %v297_v17 = vmul.f32 %v293_v1, %v289_v14 }
  0xc2   : > { %v281_v18 = vmul.f32 %v526_v61, %v280_v15 }
  0xc3   : > { %v271_v19 = vmul.f32 %v528_v63, %v270_v16 }
  0xc4   : > { %v285_v20 = vsel %vm284_vm10, %v526_v61, %v281_v18  ;;  %303 = sbr.rel (%p436_p1) target bundleno = 205 (0xcd), region = 40 }
  0xc5   : > { %v291_v22 = vmul.f32 %v287_v54, %v285_v20  ;;  %v275_v23 = vsel %vm274_vm12, %v528_v63, %v271_v19 }
  0xc6   : > { %v290_v24 = vmul.f32 %v287_v54, %v275_v23 }
  0xc7   : > { %v299_v25 = vmul.f32 %v295_v21, %v291_v22 }
  0xc8   : > { %v298_v26 = vmul.f32 %v294_v5, %v290_v24 }
  0xc9   : > { %304 = vst.msk [vmem:[#allocation2] sm:$0xff] %vm193_vm0, %v296_v2 }
  0xca   : > { %305 = vst.msk [vmem:[#allocation2 + $0x8] sm:$0xff] %vm193_vm0, %v297_v17 }
  0xcb   : > { %306 = vst.msk [vmem:[#allocation2 + $0x10] sm:$0xff] %vm193_vm0, %v298_v26 }
  0xcc   : > { %307 = vst.msk [vmem:[#allocation2 + $0x18] sm:$0xff] %vm193_vm0, %v299_v25 }
  0xcd PF: > { %p437_p2 = scmp.le.s32.totalorder %s652_s12, 0 }
  0xcf   : > { %311 = sbr.rel (%p437_p2) target bundleno = 219 (0xdb), region = 44 }
  0xd4   : > { %v312_v7 = vld [vmem:[#allocation2] sm:$0xff]  ;;  %v313_v0 = vld [vmem:[#allocation2 + $0x8] sm:$0xff]  ;;  %v314_v27 = vld [vmem:[#allocation2 + $0x10] sm:$0xff] }
  0xd5   : > { %v316_v28 = vadd.f32 %v312_v7, %v296_v2  ;;  %v317_v29 = vadd.f32 %v313_v0, %v297_v17  ;;  %v318_v30 = vadd.f32 %v314_v27, %v298_v26  ;;  %v315_v31 = vld [vmem:[#allocation2 + $0x18] sm:$0xff] }
  0xd6   : > { %v319_v32 = vadd.f32 %v315_v31, %v299_v25 }
  0xd7   : > { %320 = vst.msk [vmem:[#allocation2] sm:$0xff] %vm193_vm0, %v316_v28 }
  0xd8   : > { %321 = vst.msk [vmem:[#allocation2 + $0x8] sm:$0xff] %vm193_vm0, %v317_v29 }
  0xd9   : > { %322 = vst.msk [vmem:[#allocation2 + $0x10] sm:$0xff] %vm193_vm0, %v318_v30 }
  0xda   : > { %323 = vst.msk [vmem:[#allocation2 + $0x18] sm:$0xff] %vm193_vm0, %v319_v32 }
  0xdb PF: > { %p438_p3 = scmp.ne.s32.totalorder %s652_s12, 7 }
  0xdd   : > { %327 = sbr.rel (%p438_p3) target bundleno = 231 (0xe7), region = 48 }
  0xe2   : > { %v328_v33 = vld [vmem:[#allocation2] sm:$0xff]  ;;  %v329_v34 = vld [vmem:[#allocation2 + $0x8] sm:$0xff]  ;;  %v330_v35 = vld [vmem:[#allocation2 + $0x10] sm:$0xff] }
  0xe3   : > { %332 = vst.msk [vmem:[#allocation8] sm:$0xff] %vm193_vm0, %v328_v33  ;;  %v331_v36 = vld [vmem:[#allocation2 + $0x18] sm:$0xff] }
  0xe4   : > { %333 = vst.msk [vmem:[#allocation8 + $0x8] sm:$0xff] %vm193_vm0, %v329_v34 }
  0xe5   : > { %334 = vst.msk [vmem:[#allocation8 + $0x10] sm:$0xff] %vm193_vm0, %v330_v35 }
  0xe6   : > { %335 = vst.msk [vmem:[#allocation8 + $0x18] sm:$0xff] %vm193_vm0, %v331_v36 }
  0xe7 PF: > { %p465_p4 = scmp.eq.s32.totalorder %s426_s15, 7  ;;  %s346_s12 = sshll.u32 %s863_s2, 4  ;;  %s347_s12 = int_to_ptr.hbm [resolvable:$true] %s346_s12 }
  0xe8   : > { %s665_s23 = smov [#allocation8]   ;;  %s666_s28 = smov 128  }
  0xe9   : > { %s344_s24 = sshll.u32 %s665_s23, 4  ;;  %s667_s29 = smov 8   ;;  %s345_s24 = int_to_ptr.vmem [resolvable:$true] %s344_s24 }
  0xea   : > { %451 = dma.vmem_to_hbm [thread:$0]  (%p465_p4), %s345_s24, 512, %s347_s12, [#allocation5], %s666_s28, %s666_s28, %s667_s29  }
  0xeb   : > { %635 = dma.done.wait (%p465_p4), [#allocation5], 512  }
  0xec   : > { %637 = vsyncadd (%p465_p4), [#allocation5], 4294966784 }
  0xed PF: > { %s17_s14 = sadd.s32 1, %s660_s14   ;;  %s868_s9 = smov %s644_s10 }
  0xee   : > { %p14_p5 = scmp.ge.s32.totalorder %s17_s14, 10   ;;  %s869_s10 = smov %s648_s11 }
  0xef   : > { %s870_s11 = smov %s760_s8  ;;  %s871_s12 = smov %s656_s13 }
  0xf0   : > { %s872_s13 = smov %s874_s26  ;;  %16 = sbr.rel (!%p14_p5) target bundleno = 6 (0x6), region = 83 }
  0xf5   :  { %363 = vsyncpa [#allocation4], 1 }
  0xf6   :  { %365 = vsyncpa [#allocation4 + $0x1], 1 }
  0xf7   :  { %366 = vsyncpa [#allocation5], 1 }
  0xf8   :  { %368 = vsyncpa [#allocation5 + $0x1], 1 }
  0xf9   :  { %369 = vsyncpa [#allocation6], 1 }
  0xfa   :  { %371 = vsyncpa [#allocation6 + $0x1], 1 }

</bundles_post_ra>
